<compile_context>
chip_gen: v7x
topology: tpu7x:2x2x1
jax: 0.10.0
libtpu: 0.0.40
codegen_flags: <defaults>
</compile_context>

<pallas_src>
import functools

import jax
import jax.numpy as jnp
from jax.experimental import pallas as pl
from jax.experimental.pallas import tpu as pltpu


# ----------------------------------------------------------------------------
# VMEM budget (generation aware)
# ----------------------------------------------------------------------------
@functools.lru_cache(maxsize=1)
def _vmem_limit_bytes():
    try:
        cap = int(pltpu.get_tpu_info().vmem_capacity_bytes)
    except Exception:
        cap = 64 * 1024 * 1024  # conservative fallback (safe on v7x)
    # ~3/4 of physical, clamped to [32, 96] MiB (v5e/v6e -> 96, v7x -> 48).
    return max(32 * 1024 * 1024, min((cap * 3) // 4, 96 * 1024 * 1024))


# ----------------------------------------------------------------------------
# Pallas kernels
# ----------------------------------------------------------------------------
def _apply_act(y, act):
    if act == "relu":
        return jnp.maximum(y, 0.0)
    if act == "sigmoid":
        return jax.nn.sigmoid(y)
    return y


def _mlp_chain_kernel(x_ref, *refs, n_layers, acts):
    """refs = (w1, b1, ..., wn, bn, o_ref); y = actN(...act1(x@W1+b1)...)."""
    o_ref = refs[-1]
    y = x_ref[...]                                   # bf16 tile (tile_m, K)
    for i in range(n_layers):
        w = refs[2 * i][...]                         # bf16, resident in VMEM
        b = refs[2 * i + 1][...].astype(jnp.float32)
        y = jnp.dot(y, w, preferred_element_type=jnp.float32) + b
        y = _apply_act(y, acts[i])
        if i < n_layers - 1:
            y = y.astype(jnp.bfloat16)               # bf16 back onto the MXU
    o_ref[...] = y.astype(o_ref.dtype)


def _fused_add_mlp_kernel(x_ref, add_ref, *refs, n_pre, acts, z):
    """Two-input fused chain:
       run layers 0..n_pre-1 on x; after the (n_pre-1)-th matmul+bias, add the
       second input (before that layer's activation); run the remaining layers;
       if z > 1, mean-reduce over groups of z consecutive rows (Z reduction
       collapsed inside the kernel)."""
    o_ref = refs[-1]
    wb = refs[:-1]
    n_layers = len(wb) // 2
    y = x_ref[...]                                   # bf16 (rows, K)
    add = add_ref[...]                               # bf16 (rows, N_add)
    for i in range(n_layers):
        w = wb[2 * i][...]
        b = wb[2 * i + 1][...].astype(jnp.float32)
        y = jnp.dot(y, w, preferred_element_type=jnp.float32) + b
        if i == n_pre - 1:
            y = y + add.astype(jnp.float32)
        y = _apply_act(y, acts[i])
        if i < n_layers - 1:
            y = y.astype(jnp.bfloat16)
    if z > 1:
        rows, n_out = y.shape
        y = y.reshape(rows // z, z, n_out)
        y = jnp.sum(y, axis=1) * (1.0 / z)           # mean over Z, in-kernel
    o_ref[...] = y.astype(o_ref.dtype)


# ----------------------------------------------------------------------------
# Wrappers
# ----------------------------------------------------------------------------
def _round_up(x, m):
    return ((x + m - 1) // m) * m


def _pick_tile_m(m, cap=2048):
    """Row tile: multiple of 8, <= cap; single grid step when M fits."""
    return max(8, min(cap, _round_up(max(m, 8), 8)))


def _weight_specs_and_args(layers, in_specs, args):
    for (w, b) in layers:
        Kw, Nw = w.shape
        in_specs.append(pl.BlockSpec((Kw, Nw), lambda i: (0, 0)))
        in_specs.append(pl.BlockSpec((1, Nw), lambda i: (0, 0)))
        args += [w.astype(jnp.bfloat16), b.reshape(1, Nw).astype(jnp.float32)]


def fused_mlp(x, layers, acts, tile_m_cap=2048, out_dtype=jnp.bfloat16):
    """x: (M, K); layers: list of (w:(K_i,N_i) bf16, b:(N_i,) f32)."""
    M, K = x.shape
    tile_m = _pick_tile_m(M, tile_m_cap)
    pad_m = (-M) % tile_m
    xp = jnp.pad(x, ((0, pad_m), (0, 0))) if pad_m else x
    Mp = M + pad_m

    in_specs = [pl.BlockSpec((tile_m, K), lambda i: (i, 0))]
    args = [xp.astype(jnp.bfloat16)]
    _weight_specs_and_args(layers, in_specs, args)
    n_out = layers[-1][0].shape[1]

    out = pl.pallas_call(
        functools.partial(_mlp_chain_kernel, n_layers=len(layers),
                          acts=tuple(acts)),
        out_shape=jax.ShapeDtypeStruct((Mp, n_out), out_dtype),
        grid=(Mp // tile_m,),
        in_specs=in_specs,
        out_specs=pl.BlockSpec((tile_m, n_out), lambda i: (i, 0)),
        compiler_params=pltpu.CompilerParams(
            dimension_semantics=("parallel",),
            vmem_limit_bytes=_vmem_limit_bytes()),
    )(*args)
    return out[:M] if pad_m else out


def fused_add_mlp(x, add, layers, acts, n_pre, z=1, row_cap=4096,
                  out_dtype=jnp.bfloat16):
    """x: (M*z, K), add: (M*z, N_pre).  Output: (M, N_out) (mean over z)."""
    Mz, K = x.shape
    assert Mz % z == 0
    assert layers[n_pre - 1][0].shape[1] == add.shape[1]
    M = Mz // z
    cap = max(8, min(2048, (row_cap // z) // 8 * 8))
    tile_m = _pick_tile_m(M, cap)                    # output rows per step
    pad_m = (-M) % tile_m
    if pad_m:
        x = jnp.pad(x, ((0, pad_m * z), (0, 0)))
        add = jnp.pad(add, ((0, pad_m * z), (0, 0)))
    Mp = M + pad_m
    N_add = add.shape[1]

    in_specs = [pl.BlockSpec((tile_m * z, K), lambda i: (i, 0)),
                pl.BlockSpec((tile_m * z, N_add), lambda i: (i, 0))]
    args = [x.astype(jnp.bfloat16), add.astype(jnp.bfloat16)]
    _weight_specs_and_args(layers, in_specs, args)
    n_out = layers[-1][0].shape[1]

    out = pl.pallas_call(
        functools.partial(_fused_add_mlp_kernel, n_pre=n_pre,
                          acts=tuple(acts), z=z),
        out_shape=jax.ShapeDtypeStruct((Mp, n_out), out_dtype),
        grid=(Mp // tile_m,),
        in_specs=in_specs,
        out_specs=pl.BlockSpec((tile_m, n_out), lambda i: (i, 0)),
        compiler_params=pltpu.CompilerParams(
            dimension_semantics=("parallel",),
            vmem_limit_bytes=_vmem_limit_bytes()),
    )(*args)
    return out[:M] if pad_m else out


def patchify_conv(x_nhwc, k, layers, acts):
    """Conv with kernel==stride==k on NHWC input, via the fused Pallas matmul."""
    N, H, W, C = x_nhwc.shape
    x = x_nhwc.reshape(N, H // k, k, W // k, k, C)
    x = x.transpose(0, 1, 3, 2, 4, 5).reshape(N * (H // k) * (W // k), k * k * C)
    y = fused_mlp(x, layers, acts)
    return y.reshape(N, H // k, W // k, -1)


# ----------------------------------------------------------------------------
# Glue: voxel projection + bilinear sampling (data-dependent gather; plain JAX)
# ----------------------------------------------------------------------------
def project_voxels(points, rots, trans, intrins, H_img, W_img, downsample):
    """points: (B, P, 3) ego frame. rots/trans: cam->ego. Returns feature-pixel
    coords (B, S, P, 2) and validity mask (B, S, P)."""
    p = points[:, None]                                     # (B, 1, P, 3)
    p_cam = jnp.einsum("bsij,bspj->bspi",
                       jnp.swapaxes(rots, -1, -2),
                       p - trans[:, :, None, :])
    z = p_cam[..., 2]
    pix = jnp.einsum("bsij,bspj->bspi", intrins, p_cam)
    eps = 1e-6
    u = pix[..., 0] / jnp.maximum(pix[..., 2], eps)
    v = pix[..., 1] / jnp.maximum(pix[..., 2], eps)
    valid = (z > eps) & (u >= 0) & (u <= W_img - 1) & (v >= 0) & (v <= H_img - 1)
    xy = jnp.stack([u / downsample, v / downsample], axis=-1)
    return xy, valid.astype(jnp.float32)


def _bilinear_sample_one(feat, xy, valid):
    """feat: (Hf, Wf, C) bf16, xy: (P, 2) feature-pixel coords, valid: (P,)."""
    Hf, Wf, _ = feat.shape
    x, y = xy[:, 0], xy[:, 1]
    x0f, y0f = jnp.floor(x), jnp.floor(y)
    wx1, wy1 = x - x0f, y - y0f
    wx0, wy0 = 1.0 - wx1, 1.0 - wy1

    def gather(yy, xx):
        yy = jnp.clip(yy, 0, Hf - 1).astype(jnp.int32)
        xx = jnp.clip(xx, 0, Wf - 1).astype(jnp.int32)
        return feat[yy, xx].astype(jnp.float32)              # bf16 taps -> f32

    out = (gather(y0f, x0f) * (wy0 * wx0)[:, None]
           + gather(y0f, x0f + 1) * (wy0 * wx1)[:, None]
           + gather(y0f + 1, x0f) * (wy1 * wx0)[:, None]
           + gather(y0f + 1, x0f + 1) * (wy1 * wx1)[:, None])
    return out * valid[:, None]


# ----------------------------------------------------------------------------
# Parameters (deterministic, in-script; zero-padded to lane-friendly shapes)
# ----------------------------------------------------------------------------
def _init_linear(key, k_in, n_out, k_pad=None, n_pad=None):
    """Weight (k_pad, n_pad) bf16 with the logical (k_in, n_out) block random and
    the padding exactly zero; bias (n_pad,) f32 zeros."""
    k_pad = k_in if k_pad is None else k_pad
    n_pad = n_out if n_pad is None else n_pad
    w = jax.random.normal(key, (k_in, n_out), jnp.float32) * (1.0 / jnp.sqrt(k_in))
    wp = jnp.zeros((k_pad, n_pad), jnp.float32).at[:k_in, :n_out].set(w)
    bp = jnp.zeros((n_pad,), jnp.float32)
    return wp.astype(jnp.bfloat16), bp


def build_params(n_classes=4):
    key = jax.random.PRNGKey(42)
    keys = iter(jax.random.split(key, 32))
    nk = lambda: next(keys)

    C_vt = 128              # out_c_vt / out_c_base_neck

    p = {}
    # backbone (EfficientNet b4, downsample 8) -- patchify stages
    # logical channels [56, 160], zero-padded to [128, 256] for lane density
    p["bb1"] = _init_linear(nk(), 8 * 8 * 3, 56, n_pad=128)          # stride 8
    p["bb2"] = _init_linear(nk(), 2 * 2 * 128, 160, n_pad=256)       # stride 16
    # neck: AlignRes(upsample x2) + concat(128+256) -> doubleconv -> tail.
    # Layer-1 weight is SPLIT: W_a applied to feat8, W_b applied to feat16 at
    # 1/4 resolution (1x1 conv commutes with nearest upsample); bias in W_a half.
    p["neck1a"] = _init_linear(nk(), C_vt, C_vt)
    w_b, _ = _init_linear(nk(), 160, C_vt, k_pad=256)
    p["neck1b"] = (w_b, jnp.zeros((C_vt,), jnp.float32))             # no bias
    p["neck2"] = _init_linear(nk(), C_vt, C_vt)
    p["neck3"] = _init_linear(nk(), C_vt, C_vt)
    # positional encoding MLP: 3*2*8=48 (padded to 64) -> 256 -> 256 -> 128
    p["pe"] = [_init_linear(nk(), 48, 2 * C_vt, k_pad=64),
               _init_linear(nk(), 2 * C_vt, 2 * C_vt),
               _init_linear(nk(), 2 * C_vt, C_vt)]
    # height compression MLP (4 layers, 128 -> 128)
    p["hc"] = [_init_linear(nk(), C_vt, C_vt) for _ in range(4)]
    # autoencoder (SparseUNet, simplified) + pre-merged heads
    ae = [_init_linear(nk(), C_vt, C_vt) for _ in range(2)]
    # BEVConvHead binimg (128->1) and output_conv (1->n_classes), pre-multiplied
    # TODO(synk): valid only if no nonlinearity sits between the two convs.
    w_bin = jax.random.normal(nk(), (C_vt, 1), jnp.float32) / jnp.sqrt(C_vt)
    b_bin = jnp.zeros((1,), jnp.float32)
    w_out = jax.random.normal(nk(), (1, n_classes), jnp.float32)
    b_out = jnp.zeros((n_classes,), jnp.float32)
    w_head = w_bin @ w_out                                  # (128, n_classes)
    b_head = b_bin @ w_out + b_out                          # (n_classes,)
    w_head_p = (jnp.zeros((C_vt, 128), jnp.float32)
                .at[:, :n_classes].set(w_head).astype(jnp.bfloat16))
    b_head_p = jnp.zeros((128,), jnp.float32).at[:n_classes].set(b_head)
    p["ae_head"] = ae + [(w_head_p, b_head_p)]
    # bev_aug parameter (identity 4x4, as in nn.Parameter(torch.eye(4)))
    p["bev_aug"] = jnp.eye(4, dtype=jnp.float32)
    return p


# ----------------------------------------------------------------------------
# Forward pass
# ----------------------------------------------------------------------------
SPATIAL_BOUNDS = (-49.75, 49.75, -49.75, 49.75, -3.375, 5.375)


def pointbev_forward(params, images, intrinsics, extrinsics,
                     bev_hw=(16, 16), z_bins=8, n_classes=4):
    B, S, C, H, W = images.shape
    Xb, Yb = bev_hw
    Z = z_bins
    downsample = 8
    Cn = 128

    rots = extrinsics[:, :, :3, :3]                     # (B, S, 3, 3), cam->ego
    trans = extrinsics[:, :, :3, 3]                     # (B, S, 3)

    # ---- backbone (fused Pallas patchify convs, bf16) --------------------
    # cast to bf16 BEFORE the NCHW->NHWC transpose (halves transpose bytes)
    imgs = images.astype(jnp.bfloat16).reshape(B * S, C, H, W).transpose(0, 2, 3, 1)
    feat8 = patchify_conv(imgs, 8, [params["bb1"]], ("relu",))
    # stage-2 patchify fused with the neck's W_b half (applied at 1/4 res)
    y16 = patchify_conv(feat8, 2, [params["bb2"], params["neck1b"]],
                        ("relu", "none"))                         # (BS,Hf/2,Wf/2,128)

    # ---- neck: feat8 @ W_a + upsample(feat16 @ W_b) + b, then 2 layers ----
    y16_up = jnp.repeat(jnp.repeat(y16, 2, axis=1), 2, axis=2)    # 128-ch, cheap
    BS, Hf, Wf, _ = feat8.shape
    neck_feat = fused_add_mlp(
        feat8.reshape(BS * Hf * Wf, Cn),
        y16_up.reshape(BS * Hf * Wf, Cn),
        [params["neck1a"], params["neck2"], params["neck3"]],
        ("relu", "relu", "none"), n_pre=1)
    neck_feat = neck_feat.reshape(BS, Hf, Wf, Cn)                 # bf16

    # ---- projector: dense voxel grid in ego frame (Z innermost) ----------
    sb = SPATIAL_BOUNDS
    xs = jnp.linspace(sb[0], sb[1], Xb)
    ys = jnp.linspace(sb[2], sb[3], Yb)
    zs = jnp.linspace(sb[4], sb[5], Z)
    gx, gy, gz = jnp.meshgrid(xs, ys, zs, indexing="ij")
    pts = jnp.stack([gx, gy, gz], axis=-1).reshape(-1, 3)          # (P, 3)
    P = pts.shape[0]

    # bev_aug and egoTin_to_seq (both identity here, applied for fidelity)
    ego_to_seq = jnp.tile(jnp.eye(4, dtype=jnp.float32)[None], (B, 1, 1))
    bev_aug = jnp.tile(params["bev_aug"][None], (B, 1, 1))
    pts_h = jnp.concatenate([pts, jnp.ones((P, 1), jnp.float32)], axis=-1)
    pts_b = jnp.einsum("bij,bkj,pk->bpi", ego_to_seq, bev_aug, pts_h)[..., :3]

    # ---- view transform: project + bilinear grid sample (bf16 gather) ----
    # TODO(synk): data-dependent gather kept in JAX; a scalar-prefetch DMA
    #             gather kernel would overlap this fetch with the MLPs below.
    xy, valid = project_voxels(pts_b, rots, trans, intrinsics, H, W, downsample)
    xy_bs = xy.reshape(B * S, P, 2)
    valid_bs = valid.reshape(B * S, P)
    sampled = jax.vmap(_bilinear_sample_one)(neck_feat, xy_bs, valid_bs)
    sampled = sampled.reshape(B, S, P, Cn)
    denom = jnp.maximum(valid.reshape(B, S, P).sum(axis=1), 1e-6)[..., None]
    cam_feat = sampled.sum(axis=1) / denom                         # (B, P, 128)

    # ---- Fourier features (JAX) ------------------------------------------
    lo = jnp.array([sb[0], sb[2], sb[4]], jnp.float32)
    hi = jnp.array([sb[1], sb[3], sb[5]], jnp.float32)
    coords_n = (pts_b - lo) / (hi - lo) * 2.0 - 1.0                # (B, P, 3)
    freqs = (2.0 ** jnp.arange(8)).astype(jnp.float32)
    ang = coords_n[..., None] * freqs * jnp.pi                     # (B, P, 3, 8)
    pe = jnp.concatenate([jnp.sin(ang), jnp.cos(ang)], axis=-1).reshape(B * P, 48)
    pe = jnp.pad(pe, ((0, 0), (0, 16)))                            # lane pad 48->64

    # ---- ONE fused kernel: PE-MLP(3) + cam_feat add + HC-MLP(4) + Z-mean --
    # Voxel flattening has Z innermost, so no HBM transpose is needed: the
    # kernel folds groups of Z consecutive rows into one BEV cell.
    bev = fused_add_mlp(
        pe, cam_feat.reshape(B * P, Cn),
        params["pe"] + params["hc"],
        ("relu", "relu", "none", "relu", "relu", "relu", "none"),
        n_pre=3, z=Z)                                              # (B*Xb*Yb,128)

    # ---- autoencoder + binimg head + output_conv (single fused kernel) ---
    out = fused_mlp(bev, params["ae_head"], ("relu", "relu", "none"))
    logits = out[:, :n_classes].astype(jnp.float32)
    logits = logits.reshape(B, Xb, Yb, n_classes)

    # back to NCHW like the PyTorch module
    return logits.transpose(0, 3, 1, 2)                            # (B,n_cls,Xb,Yb)


# ----------------------------------------------------------------------------
if __name__ == "__main__":
    B, S, C, H, W = 2, 2, 3, 32, 32
    n_classes = 4
    key = jax.random.PRNGKey(0)
    k_img, _ = jax.random.split(key)
    images = jax.random.normal(k_img, (B, S, C, H, W), jnp.float32)

    # intrinsics (B, S, 3, 3)
    K = jnp.array([[float(W), 0.0, W / 2.0],
                   [0.0, float(H), H / 2.0],
                   [0.0, 0.0, 1.0]], jnp.float32)
    intrinsics = jnp.tile(K[None, None], (B, S, 1, 1))

    # extrinsics (B, S, 4, 4), cam->ego; camera z forward maps to ego x forward
    R = jnp.array([[0.0, 0.0, 1.0],
                   [-1.0, 0.0, 0.0],
                   [0.0, -1.0, 0.0]], jnp.float32)
    E = jnp.eye(4, dtype=jnp.float32)
    E = E.at[:3, :3].set(R)
    exts = []
    for s in range(S):
        t = jnp.array([0.5 * s, 0.2 * s, 1.5], jnp.float32)
        exts.append(E.at[:3, 3].set(t))
    extrinsics = jnp.tile(jnp.stack(exts)[None], (B, 1, 1, 1))

    params = build_params(n_classes=n_classes)
    out = pointbev_forward(params, images, intrinsics, extrinsics,
                           bev_hw=(16, 16), z_bins=8, n_classes=n_classes)
    jax.block_until_ready(out)
    assert out.shape == (B, n_classes, 16, 16), out.shape
    assert jnp.all(jnp.isfinite(out))
    print("KERNEL_OK")
</pallas_src>

<mosaic_0001>
module attributes {stable_mosaic.version = 11 : i64} {
  func.func @_mlp_chain_kernel(%arg0: i32, %arg1: memref<64x192xbf16, #tpu.memory_space<vmem>>, %arg2: memref<192x128xbf16, #tpu.memory_space<vmem>>, %arg3: memref<1x128xf32, #tpu.memory_space<vmem>>, %arg4: memref<64x128xbf16, #tpu.memory_space<vmem>>) attributes {dimension_semantics = [#tpu.dimension_semantics<parallel>], iteration_bounds = array<i64: 1>, scalar_prefetch = 0 : i64, scratch_operands = 0 : i64, tpu.core_type = #tpu.core_type<tc>, window_params = [{transform_indices = @transform_0, window_bounds = array<i64: 64, 192>}, {pipeline_mode = #tpu.pipeline_mode<synchronous>, transform_indices = @transform_1, window_bounds = array<i64: 192, 128>}, {pipeline_mode = #tpu.pipeline_mode<synchronous>, transform_indices = @transform_2, window_bounds = array<i64: 1, 128>}, {transform_indices = @transform_3, window_bounds = array<i64: 64, 128>}]} {
    %c0 = arith.constant 0 : index
    %c0_0 = arith.constant 0 : index
    %0 = vector.load %arg1[%c0, %c0_0] : memref<64x192xbf16, #tpu.memory_space<vmem>>, vector<64x192xbf16>
    %c0_1 = arith.constant 0 : index
    %c0_2 = arith.constant 0 : index
    %1 = vector.load %arg2[%c0_1, %c0_2] : memref<192x128xbf16, #tpu.memory_space<vmem>>, vector<192x128xbf16>
    %c0_3 = arith.constant 0 : index
    %c0_4 = arith.constant 0 : index
    %2 = vector.load %arg3[%c0_3, %c0_4] : memref<1x128xf32, #tpu.memory_space<vmem>>, vector<1x128xf32>
    %cst = arith.constant dense<0.000000e+00> : vector<64x128xf32>
    %3 = tpu.matmul %0, %1, %cst {dimension_numbers = #tpu.dot_dimension_numbers<[1], [0], [0], [1], [0, 0, 1, 1], [], []>} : vector<64x192xbf16>, vector<192x128xbf16>, vector<64x128xf32> -> vector<64x128xf32>
    %4 = vector.broadcast %2 : vector<1x128xf32> to vector<64x128xf32>
    %5 = arith.addf %3, %4 : vector<64x128xf32>
    %cst_5 = arith.constant 0.000000e+00 : f32
    %6 = vector.broadcast %cst_5 : f32 to vector<64x128xf32>
    %7 = arith.maximumf %5, %6 : vector<64x128xf32>
    %8 = arith.truncf %7 : vector<64x128xf32> to vector<64x128xbf16>
    %c0_6 = arith.constant 0 : index
    %c0_7 = arith.constant 0 : index
    %9 = vector.load %arg4[%c0_6, %c0_7] : memref<64x128xbf16, #tpu.memory_space<vmem>>, vector<64x128xbf16>
    tpu.vector_store %arg4[%c0_6, %c0_7], %8 {strides = array<i32>} : memref<64x128xbf16, #tpu.memory_space<vmem>>, vector<64x128xbf16>,
    return
  }
  func.func @transform_0(%arg0: i32) -> (i32, i32) {
    %c0_i32 = arith.constant 0 : i32
    %c0_i32_0 = arith.constant 0 : i32
    return %arg0, %c0_i32 : i32, i32
  }
  func.func @transform_1(%arg0: i32) -> (i32, i32) {
    %c0_i32 = arith.constant 0 : i32
    %c0_i32_0 = arith.constant 0 : i32
    %c0_i32_1 = arith.constant 0 : i32
    return %c0_i32, %c0_i32_0 : i32, i32
  }
  func.func @transform_2(%arg0: i32) -> (i32, i32) {
    %c0_i32 = arith.constant 0 : i32
    %c0_i32_0 = arith.constant 0 : i32
    %c0_i32_1 = arith.constant 0 : i32
    return %c0_i32, %c0_i32_0 : i32, i32
  }
  func.func @transform_3(%arg0: i32) -> (i32, i32) {
    %c0_i32 = arith.constant 0 : i32
    %c0_i32_0 = arith.constant 0 : i32
    return %arg0, %c0_i32 : i32, i32
  }
}

</mosaic_0001>

<bundles_post_ra>
// kernel: tpu_custom_call.1
= control target key start
LH: loop header
LB: loop body
LE: loop exit
PB: predicated region body
PF: predicated region fallthrough
CT: control target
= control target key end

     0   :  { %8 = vsyncpa [#allocation3], 0  ;;  %s604_s0 = inlined_call_operand.hbm [shape: bf16[64,192], index: 0, kind: input, shape index: {}]   ;;  %s605_s1 = inlined_call_operand.hbm [shape: bf16[192,128], index: 1, kind: input, shape index: {}]   ;;  %s606_s2 = inlined_call_operand.vmem [shape: f32[1,128], index: 2, kind: input, shape index: {}]   ;;  %s607_s3 = inlined_call_operand.hbm [shape: bf16[64,128], index: 3, kind: output, shape index: {}]  }
   0x1   :  { %9 = vsyncpa [#allocation6], 0 }
   0x2   :  { %10 = vsyncpa [#allocation4], 0  ;;  %s527_s12 = smov [#allocation2]   ;;  %s455_s16 = scalar_lea.hbm %s604_s0, 1024 }
   0x3   :  { %s16_s13 = sshll.u32 %s527_s12, 4  ;;  %p456_p0 = scmp.ne.s32.totalorder %s604_s0, %s455_s16  ;;  %s17_s13 = int_to_ptr.vmem [resolvable:$true] %s16_s13 }
   0x4   :  { %p459_p1 = scmp.lt.u32.totalorder %s455_s16, %s604_s0 }
   0x6   :  { %p461_p2 = pnand %p459_p1, %p456_p0 }
   0x8   :  { %464 = shalt.err (!%p461_p2)
}
   0x9   :  { %s465_s21 = scalar_lea.vmem %s17_s13, 1024  ;;  %p470_p4 = scmp.lt.s32.totalorder %s17_s13, %s17_s13 }
   0xa   :  { %p466_p3 = scmp.ne.s32.totalorder %s17_s13, %s465_s21  ;;  %p471_p5 = scmp.lt.s32.totalorder %s465_s21, %s465_s21 }
   0xc   :  { %p472_p6 = por %p471_p5, %p470_p4 }
   0xe   :  { %p473_p7 = pnand %p472_p6, %p466_p3 }
  0x10   :  { %476 = shalt.err (!%p473_p7)
}
  0x11   :  { %s528_s22 = smov 128   ;;  %s529_s23 = smov 8  }
  0x12   :  { %22 = dma.hbm_to_vmem [thread:$0]  %s604_s0, 1024, %s17_s13, [#allocation3], %s528_s22, %s528_s22, %s529_s23  }
  0x13   :  { %s530_s26 = smov [#allocation5]   ;;  %s477_s30 = scalar_lea.hbm %s605_s1, 1536 }
  0x14   :  { %s28_s27 = sshll.u32 %s530_s26, 4  ;;  %p478_p8 = scmp.ne.s32.totalorder %s605_s1, %s477_s30  ;;  %s29_s27 = int_to_ptr.vmem [resolvable:$true] %s28_s27 }
  0x15   :  { %p481_p9 = scmp.lt.u32.totalorder %s477_s30, %s605_s1 }
  0x17   :  { %p483_p10 = pnand %p481_p9, %p478_p8 }
  0x19   :  { %486 = shalt.err (!%p483_p10)
}
  0x1a   :  { %s487_s8 = scalar_lea.vmem %s29_s27, 1536  ;;  %p492_p12 = scmp.lt.s32.totalorder %s29_s27, %s29_s27 }
  0x1b   :  { %p488_p11 = scmp.ne.s32.totalorder %s29_s27, %s487_s8  ;;  %p493_p13 = scmp.lt.s32.totalorder %s487_s8, %s487_s8 }
  0x1d   :  { %p494_p0 = por %p493_p13, %p492_p12 }
  0x1f   :  { %p495_p1 = pnand %p494_p0, %p488_p11 }
  0x21   :  { %498 = shalt.err (!%p495_p1)
}
  0x22   :  { %s531_s0 = smov 64   ;;  %s532_s9 = smov 4  }
  0x23   :  { %34 = dma.hbm_to_vmem [thread:$0]  %s605_s1, 1536, %s29_s27, [#allocation6], %s531_s0, %s531_s0, %s532_s9  }
  0x24   :  { %521 = dma.done.wait [#allocation3], 1024  }
  0x25   :  { %522 = vsyncadd [#allocation3], 4294966272 }
  0x26   :  { %523 = dma.done.wait [#allocation6], 1536  }
  0x27   :  { %524 = vsyncadd [#allocation6], 4294965760  ;;  %v533_v0 = vmov 0   ;;  %v431_v1 = vld [vmem:[#allocation5] sm:$0xff]   ;;  %v432_v2 = vld [vmem:[#allocation5 + $0x8] sm:$0xff]   ;;  %vm191_vm0 = vcmask 523264  }
  0x28   :  { %204 = vmatprep.subr.bf16.mxu0 %v533_v0  ;;  %399 = vmatprep.subr.bf16.mxu1 %v533_v0  ;;  %v433_v3 = vld [vmem:[#allocation5 + $0x10] sm:$0xff]   ;;  %v434_v4 = vld [vmem:[#allocation5 + $0x18] sm:$0xff]   ;;  %v445_v5 = vld [vmem:[#allocation2 + $0x4] ss:$8 sps:$4 sm:$0xff]  }
  0x29   :  { %205 = vmatpush1.bf16.msra.mxu0 %v431_v1  ;;  %411 = vmatpush1.bf16.msra.mxu1 %v431_v1  ;;  %v435_v6 = vld [vmem:[#allocation5 + $0x20] sm:$0xff]   ;;  %v436_v8 = vld [vmem:[#allocation5 + $0x28] sm:$0xff]   ;;  %v437_v9 = vld [vmem:[#allocation5 + $0x30] sm:$0xff]  }
  0x2a   :  { %206 = vmatprep.subr.bf16.mxu0 %v533_v0  ;;  %400 = vmatprep.subr.bf16.mxu1 %v533_v0  ;;  %v448_v7 = vld [vmem:[#allocation2 + $0x24] ss:$8 sps:$4 sm:$0xff]   ;;  %v438_v10 = vld [vmem:[#allocation5 + $0x38] sm:$0xff]   ;;  %v441_v13 = vld [vmem:[#allocation5 + $0x50] sm:$0xff]  }
  0x2b   :  { %356 = vmatprep.mubr.msk.bf16.mxu0 %vm191_vm0, %v445_v5  ;;  %358 = vmatprep.mubr.msk.bf16.mxu1 %vm191_vm0, %v448_v7  ;;  %v439_v11 = vld [vmem:[#allocation5 + $0x40] sm:$0xff]   ;;  %v440_v12 = vld [vmem:[#allocation5 + $0x48] sm:$0xff]   ;;  %v442_v14 = vld [vmem:[#allocation5 + $0x58] sm:$0xff]  }
  0x2c   :  { %v443_v15 = vld [vmem:[#allocation2] ss:$8 sps:$4 sm:$0xff]   ;;  %v449_v17 = vld [vmem:[#allocation2 + $0x14] ss:$8 sps:$4 sm:$0xff]   ;;  %v453_v19 = vld [vmem:[#allocation2 + $0x10] ss:$8 sps:$4 sm:$0xff]  }
  0x2d   :  { %207 = vmatpush1.bf16.msra.mxu0 %v432_v2  ;;  %412 = vmatpush1.bf16.msra.mxu1 %v432_v2  ;;  %v446_v16 = vld [vmem:[#allocation2 + $0x20] ss:$8 sps:$4 sm:$0xff]   ;;  %v451_v18 = vld [vmem:[#allocation2 + $0x34] ss:$8 sps:$4 sm:$0xff]   ;;  %v454_v20 = vld [vmem:[#allocation2 + $0x30] ss:$8 sps:$4 sm:$0xff]  }
  0x2e   :  { %208 = vmatprep.subr.bf16.mxu0 %v533_v0  ;;  %401 = vmatprep.subr.bf16.mxu1 %v533_v0  ;;  %v335_v21 = vld [vmem:[%s606_s2] ss:$0 sm:$0xff]  ;;  %s534_s2 = smov [#allocation7]  }
  0x2f   :  { %s322_s13 = sshll.u32 %s534_s2, 4  ;;  %s323_s13 = int_to_ptr.vmem [resolvable:$true] %s322_s13 }
  0x30   :  { %s499_s14 = scalar_lea.vmem %s323_s13, 512  ;;  %p504_p3 = scmp.lt.s32.totalorder %s323_s13, %s323_s13 }
  0x31   :  { %209 = vmatpush1.bf16.msra.mxu0 %v433_v3  ;;  %413 = vmatpush1.bf16.msra.mxu1 %v433_v3  ;;  %p500_p2 = scmp.ne.s32.totalorder %s323_s13, %s499_s14  ;;  %p505_p4 = scmp.lt.s32.totalorder %s499_s14, %s499_s14 }
  0x32   :  { %210 = vmatprep.subr.bf16.mxu0 %v533_v0  ;;  %402 = vmatprep.subr.bf16.mxu1 %v533_v0 }
  0x33   :  { %p506_p5 = por %p505_p4, %p504_p3 }
  0x35   :  { %211 = vmatpush1.bf16.msra.mxu0 %v434_v4  ;;  %414 = vmatpush1.bf16.msra.mxu1 %v434_v4  ;;  %p507_p6 = pnand %p506_p5, %p500_p2 }
  0x36   :  { %212 = vmatprep.subr.bf16.mxu0 %v533_v0  ;;  %403 = vmatprep.subr.bf16.mxu1 %v533_v0 }
  0x39   :  { %213 = vmatpush1.bf16.msra.mxu0 %v435_v6  ;;  %415 = vmatpush1.bf16.msra.mxu1 %v435_v6 }
  0x3a   :  { %214 = vmatprep.subr.bf16.mxu0 %v533_v0  ;;  %404 = vmatprep.subr.bf16.mxu1 %v533_v0 }
  0x3d   :  { %215 = vmatpush1.bf16.msra.mxu0 %v436_v8  ;;  %416 = vmatpush1.bf16.msra.mxu1 %v436_v8 }
  0x3e   :  { %216 = vmatprep.subr.bf16.mxu0 %v533_v0  ;;  %405 = vmatprep.subr.bf16.mxu1 %v533_v0 }
  0x41   :  { %217 = vmatpush1.bf16.msra.mxu0 %v437_v9  ;;  %417 = vmatpush1.bf16.msra.mxu1 %v437_v9 }
  0x42   :  { %218 = vmatprep.subr.bf16.mxu0 %v533_v0  ;;  %406 = vmatprep.subr.bf16.mxu1 %v533_v0 }
  0x45   :  { %219 = vmatpush1.bf16.msra.mxu0 %v438_v10  ;;  %418 = vmatpush1.bf16.msra.mxu1 %v438_v10 }
  0x46   :  { %220 = vmatprep.subr.bf16.mxu0 %v533_v0  ;;  %407 = vmatprep.subr.bf16.mxu1 %v533_v0 }
  0x49   :  { %221 = vmatpush1.bf16.msra.mxu0 %v439_v11  ;;  %419 = vmatpush1.bf16.msra.mxu1 %v439_v11 }
  0x4a   :  { %222 = vmatprep.subr.bf16.mxu0 %v533_v0  ;;  %408 = vmatprep.subr.bf16.mxu1 %v533_v0 }
  0x4d   :  { %223 = vmatpush1.bf16.msra.mxu0 %v440_v12  ;;  %420 = vmatpush1.bf16.msra.mxu1 %v440_v12 }
  0x4e   :  { %224 = vmatprep.subr.bf16.mxu0 %v533_v0  ;;  %409 = vmatprep.subr.bf16.mxu1 %v533_v0 }
  0x51   :  { %225 = vmatpush1.bf16.msra.mxu0 %v441_v13  ;;  %421 = vmatpush1.bf16.msra.mxu1 %v441_v13 }
  0x52   :  { %226 = vmatprep.subr.bf16.mxu0 %v533_v0  ;;  %410 = vmatprep.subr.bf16.mxu1 %v533_v0 }
  0x55   :  { %227 = vmatpush1.bf16.msra.mxu0 %v442_v14  ;;  %422 = vmatpush1.bf16.msra.mxu1 %v442_v14 }
  0x58   :  { %237 = vmatmul.mubr.bf16.vlgmr.msra.gmra.mrb[0].mxu0 %v443_v15  ;;  %253 = vmatmul.mubr.bf16.vlgmr.msra.gmra.mrb[0].mxu1 %v446_v16 }
  0x59   :  { %357 = vmatprep.mubr.msk.bf16.mxu0 %vm191_vm0, %v449_v17  ;;  %359 = vmatprep.mubr.msk.bf16.mxu1 %vm191_vm0, %v451_v18 }
  0x60   :  { %245 = vmatmul.mubr.bf16.gmra.mrb[4].mxu0 %v453_v19  ;;  %261 = vmatmul.mubr.bf16.gmra.mrb[4].mxu1 %v454_v20 }
 0x12b   :  { %v238_v22 = vpop.f32.mrb[0].mxu0  ;;  %v254_v23 = vpop.f32.mrb[0].mxu1 }
 0x12c   :  { %v239_v24 = vadd.f32 %v335_v21, %v238_v22  ;;  %v255_v25 = vadd.f32 %v335_v21, %v254_v23  ;;  %v240_v26 = vpop.f32.mrb[1].mxu0  ;;  %v256_v27 = vpop.f32.mrb[1].mxu1 }
 0x12d   :  { %v241_v28 = vpop.f32.mrb[2].mxu0  ;;  %v257_v29 = vpop.f32.mrb[2].mxu1 }
 0x12e   :  { %v242_v30 = vadd.f32 %v335_v21, %v241_v28  ;;  %v258_v31 = vadd.f32 %v335_v21, %v257_v29  ;;  %v243_v32 = vpop.f32.mrb[3].mxu0  ;;  %v259_v33 = vpop.f32.mrb[3].mxu1  ;;  %v269_v34 = vmax.f32 %v239_v24, 0.0  ;;  %v273_v35 = vmax.f32 %v255_v25, 0.0 }
 0x130   :  { %v270_v36 = vmax.f32 %v242_v30, 0.0  ;;  %v274_v37 = vmax.f32 %v258_v31, 0.0 }
 0x132   :  { %v379_v38 = vpack.c.bf16 %v270_v36, %v269_v34  ;;  %v389_v39 = vpack.c.bf16 %v274_v37, %v273_v35 }
 0x133   :  { %v246_v40 = vpop.f32.mrb[4].mxu0  ;;  %v262_v41 = vpop.f32.mrb[4].mxu1 }
 0x134   :  { %380 = vst [vmem:[#allocation7] sm:$0xff] %v379_v38   ;;  %397 = vst [vmem:[#allocation7 + $0x10] sm:$0xff] %v389_v39   ;;  %v247_v42 = vadd.f32 %v335_v21, %v246_v40  ;;  %v263_v43 = vadd.f32 %v335_v21, %v262_v41  ;;  %v248_v44 = vpop.f32.mrb[5].mxu0  ;;  %v264_v45 = vpop.f32.mrb[5].mxu1 }
 0x135   :  { %v249_v46 = vpop.f32.mrb[6].mxu0  ;;  %v265_v47 = vpop.f32.mrb[6].mxu1 }
 0x136   :  { %v250_v48 = vadd.f32 %v335_v21, %v249_v46  ;;  %v266_v49 = vadd.f32 %v335_v21, %v265_v47  ;;  %v251_v50 = vpop.f32.mrb[7].mxu0  ;;  %v267_v51 = vpop.f32.mrb[7].mxu1  ;;  %v271_v52 = vmax.f32 %v247_v42, 0.0  ;;  %v275_v53 = vmax.f32 %v263_v43, 0.0 }
 0x138   :  { %v272_v54 = vmax.f32 %v250_v48, 0.0  ;;  %v276_v55 = vmax.f32 %v266_v49, 0.0 }
 0x13a   :  { %v384_v56 = vpack.c.bf16 %v272_v54, %v271_v52  ;;  %v394_v57 = vpack.c.bf16 %v276_v55, %v275_v53 }
 0x13c   :  { %396 = vst [vmem:[#allocation7 + $0x8] sm:$0xff] %v384_v56   ;;  %398 = vst [vmem:[#allocation7 + $0x18] sm:$0xff] %v394_v57  }
 0x13d   :  { %510 = shalt.err (!%p507_p6)
}
 0x13e   :  { %s511_s17 = scalar_lea.hbm %s607_s3, 512 }
 0x13f   :  { %p512_p7 = scmp.ne.s32.totalorder %s607_s3, %s511_s17  ;;  %p515_p8 = scmp.lt.u32.totalorder %s511_s17, %s607_s3 }
 0x141   :  { %p517_p9 = pnand %p515_p8, %p512_p7 }
 0x143   :  { %520 = shalt.err (!%p517_p9)
}
 0x144   :  { %328 = dma.vmem_to_hbm [thread:$0]  %s323_s13, 512, %s607_s3, [#allocation4], %s531_s0, %s531_s0, %s532_s9  }
 0x145   :  { %525 = dma.done.wait [#allocation4], 512  }
 0x146   :  { %526 = vsyncadd [#allocation4], 4294966784 }
 0x147   :  { %332 = vsyncpa [#allocation3], 1 }
 0x148   :  { %333 = vsyncpa [#allocation6], 1 }
 0x149   :  { %334 = vsyncpa [#allocation4], 1 }

</bundles_post_ra>
